<compile_context>
chip_gen: v7x
topology: tpu7x:2x2x1
jax: 0.10.0
libtpu: 0.0.40
codegen_flags: <defaults>
</compile_context>

<pallas_src>
import jax
import jax.numpy as jnp
from jax.experimental import pallas as pl
from jax.experimental.pallas import tpu as pltpu

HIDDEN = 32
NUM_LAYERS = 3
KSIZE = 3
BN_EPS = 1e-5
G = 4                                          # lane groups: 4 batches x 32 ch = 128 lanes
PAD = 8                                        # halo width; keeps the scratch centre sublane-aligned
MAX_DIL = 1 << (NUM_LAYERS - 1)                # 4
RECEPTIVE = 1 + sum(1 << l for l in range(NUM_LAYERS))   # 8: backward reach of the last timestep


def tcn_kernel(x_ref, cw0_ref, cw_ref, rw_ref, bn_ref, feat_ref, act_ref, xs_ref):
    """One batch-group block of the full TCN (lane-packed, G batches per vreg row).

    x_ref   : (Bg, W, G*Cin)        lane-packed input window (raw channel count)
    cw0_ref : (K, G*Cin, G*H)       block-diagonal layer-0 conv weight, one per tap
    cw_ref  : (L-1, K, G*H, G*H)    block-diagonal conv weights, layers 1..L-1
    rw_ref  : (G*Cin, G*H)          block-diagonal 1x1 residual projection (layer 0)
    bn_ref  : (2L+1, G*H)           rows 0..L-1: BN scale, L..2L-1: BN shift (conv
                                    bias folded in), row 2L: residual bias; tiled xG
    feat_ref: (Bg, G*H)             last-timestep features (fc applied outside)
    act_ref : (Bg, W+2*PAD, G*H)    zero-haloed hidden-activation scratch
    xs_ref  : (Bg, W+2*PAD, G*Cin)  zero-haloed input scratch (layer-0 taps)
    """
    Bg, W, Gc = x_ref.shape
    GH = act_ref.shape[-1]
    rows = Bg * W

    # Zero only the halo rows the dilated taps actually read; the centres are fully
    # rewritten every layer / every grid step.  Runs every step on purpose (megacore
    # safety: a core sharded onto steps > 0 would otherwise see garbage halos).
    act_ref[:, PAD - MAX_DIL:PAD, :] = jnp.zeros((Bg, MAX_DIL, GH), jnp.float32)
    act_ref[:, PAD + W:PAD + W + MAX_DIL, :] = jnp.zeros((Bg, MAX_DIL, GH), jnp.float32)
    xs_ref[:, PAD - 1:PAD, :] = jnp.zeros((Bg, 1, Gc), jnp.float32)
    xs_ref[:, PAD + W:PAD + W + 1, :] = jnp.zeros((Bg, 1, Gc), jnp.float32)

    # Stage x in the centre of its haloed scratch; layer-0 taps are shifted sublane
    # views of it (no jnp.pad / concat materialisation).
    # TODO(synk): could DMA x straight into xs_ref (memory_space=pl.ANY) to drop this
    # tiny VMEM->VMEM copy; with the 8-row window it is only W*Gc*4 bytes per group.
    x = x_ref[...]
    xs_ref[:, PAD:PAD + W, :] = x

    # Layer-0 residual path: 1x1 conv (in_channels != hidden in the original module).
    res = jnp.dot(x.reshape(rows, Gc), rw_ref[...], preferred_element_type=jnp.float32) \
        + bn_ref[2 * NUM_LAYERS:2 * NUM_LAYERS + 1, :]

    # Layer 0 (dilation 1): three accumulated MXU matmuls over shifted views; the
    # block-diagonal weight makes the output 128-lane dense.
    acc = jnp.zeros((rows, GH), jnp.float32)
    for k in range(KSIZE):
        tap = xs_ref[:, PAD - 1 + k:PAD - 1 + k + W, :].reshape(rows, Gc)
        acc = acc + jnp.dot(tap, cw0_ref[k], preferred_element_type=jnp.float32)
    y = acc * bn_ref[0:1, :] + bn_ref[NUM_LAYERS:NUM_LAYERS + 1, :]
    h = jnp.maximum(y, 0.0) + res

    # Layers 1..L-1 (dilations 2, 4): identity residual.
    for l in range(1, NUM_LAYERS):
        d = 1 << l
        act_ref[:, PAD:PAD + W, :] = h.reshape(Bg, W, GH)
        acc = jnp.zeros((rows, GH), jnp.float32)
        for k in range(KSIZE):
            s = PAD - d + k * d
            tap = act_ref[:, s:s + W, :].reshape(rows, GH)
            acc = acc + jnp.dot(tap, cw_ref[l - 1, k, :, :], preferred_element_type=jnp.float32)
        y = acc * bn_ref[l:l + 1, :] + bn_ref[NUM_LAYERS + l:NUM_LAYERS + l + 1, :]
        h = jnp.maximum(y, 0.0) + h

    # Lane-dense (Bg, 128) feature output; fc(32 -> 1) applied outside.
    feat_ref[...] = h.reshape(Bg, W, GH)[:, W - 1, :].astype(feat_ref.dtype)


def advanced_tcn_forward(x, packed):
    """x: (B, T, C_in) float. Returns (B, 1), matching AdvancedTCN.forward."""
    B, T, c_in = x.shape
    GH = packed['bn'].shape[1]
    hidden = GH // G
    Gc = G * c_in
    assert packed['rw'].shape == (Gc, GH), "packed params do not match input channels"

    # Only the trailing receptive field influences the last timestep (centred k=3
    # convs, dilations 1/2/4 -> 8 rows).  Compute on that suffix only.
    W = min(T, ((RECEPTIVE + 7) // 8) * 8)

    # Batch -> lane-group blocking.  ~512 flattened MXU rows per grid step; ensure
    # >=2 grid steps when possible (v7x megacore); keep the feat block sublane-aligned.
    NG = -(-B // G)
    bg = min(NG, max(1, 512 // max(W, 1)))
    if NG > 1 and bg >= NG:
        bg = -(-NG // 2)
    if bg < NG and bg % 8:
        bg = -(-bg // 8) * 8
    n_blocks = -(-NG // bg)
    NG_pad = n_blocks * bg
    # TODO(synk): for very large B, bg can be raised further on v6e (128 MiB VMEM,
    # bump vmem_limit_bytes) and kept ~256 on v5e; 512 rows/step is a safe default.

    # Lane-pack G batch elements side-by-side at their *raw* channel count — no 8x
    # zero-pad of the HBM input; the c_in->hidden padding lives in the block-diagonal
    # layer-0 / residual weights.
    xw = x[:, T - W:, :].astype(jnp.float32)
    xp = jnp.zeros((NG_pad * G, W, c_in), jnp.float32).at[:B].set(xw)
    xp = xp.reshape(NG_pad, G, W, c_in).transpose(0, 2, 1, 3).reshape(NG_pad, W, Gc)

    feat = pl.pallas_call(
        tcn_kernel,
        out_shape=jax.ShapeDtypeStruct((NG_pad, GH), jnp.float32),
        grid=(n_blocks,),
        in_specs=[
            pl.BlockSpec((bg, W, Gc), lambda i: (i, 0, 0)),
            pl.BlockSpec(packed['cw0'].shape, lambda i: (0, 0, 0)),
            pl.BlockSpec(packed['cw'].shape, lambda i: (0, 0, 0, 0)),
            pl.BlockSpec(packed['rw'].shape, lambda i: (0, 0)),
            pl.BlockSpec(packed['bn'].shape, lambda i: (0, 0)),
        ],
        out_specs=pl.BlockSpec((bg, GH), lambda i: (i, 0)),
        scratch_shapes=[
            pltpu.VMEM((bg, W + 2 * PAD, GH), jnp.float32),   # haloed hidden activations
            pltpu.VMEM((bg, W + 2 * PAD, Gc), jnp.float32),   # haloed lane-packed input
        ],
        compiler_params=pltpu.CompilerParams(dimension_semantics=("parallel",)),
    )(xp, packed['cw0'], packed['cw'], packed['rw'], packed['bn'])

    # Un-pack lanes back to (batch, hidden); final Linear(hidden, 1) as a trailing
    # XLA matmul so the kernel output stays 128-lane dense.
    feat = feat.reshape(NG_pad * G, hidden)[:B]
    return feat @ packed['fcw'] + packed['fcb']


# ----------------------------------------------------------------------------------
# Parameters (torch-shaped "raw" params + host-side packing for the kernel)
# ----------------------------------------------------------------------------------
def init_raw_params(key, input_size, hidden=HIDDEN):
    keys = iter(jax.random.split(key, 64))

    def nrm(shape, scale=0.1):
        return scale * jax.random.normal(next(keys), shape, dtype=jnp.float32)

    p = {}
    for i in range(NUM_LAYERS):
        c_in = input_size if i == 0 else hidden
        p[f'w{i}'] = nrm((KSIZE, c_in, hidden))          # Conv1d weight as (k, in, out)
        p[f'b{i}'] = nrm((hidden,))                      # Conv1d bias
        p[f'g{i}'] = 1.0 + nrm((hidden,))                # BN gamma
        p[f'beta{i}'] = nrm((hidden,))                   # BN beta
        p[f'mean{i}'] = nrm((hidden,))                   # BN running mean
        p[f'var{i}'] = 1.0 + jnp.abs(nrm((hidden,)))     # BN running var
    p['rw'] = nrm((input_size, hidden))                  # 1x1 residual conv (in, out)
    p['rb'] = nrm((hidden,))
    p['fcw'] = nrm((hidden, 1))                          # Linear(hidden, 1)
    p['fcb'] = nrm((1,))
    return p


def _block_diag(w, g=G):
    """(Cin, Cout) -> (g*Cin, g*Cout) block-diagonal (independent lane groups)."""
    cin, cout = w.shape
    out = jnp.zeros((g * cin, g * cout), jnp.float32)
    for i in range(g):
        out = out.at[i * cin:(i + 1) * cin, i * cout:(i + 1) * cout].set(w)
    return out


def pack_params(raw):
    """Fold conv bias + BN (eval) into scale/shift, build block-diagonal lane-packed weights."""
    cw0 = jnp.stack([_block_diag(raw['w0'][k]) for k in range(KSIZE)])          # (K, G*Cin, G*H)
    cw = jnp.stack([jnp.stack([_block_diag(raw[f'w{l}'][k]) for k in range(KSIZE)])
                    for l in range(1, NUM_LAYERS)])                             # (L-1, K, G*H, G*H)
    scales, shifts = [], []
    for l in range(NUM_LAYERS):
        scale = raw[f'g{l}'] / jnp.sqrt(raw[f'var{l}'] + BN_EPS)
        shift = (raw[f'b{l}'] - raw[f'mean{l}']) * scale + raw[f'beta{l}']
        scales.append(jnp.tile(scale, G))
        shifts.append(jnp.tile(shift, G))
    rw = _block_diag(raw['rw'])                                                 # (G*Cin, G*H)
    bn = jnp.stack(scales + shifts + [jnp.tile(raw['rb'], G)], axis=0)          # (2L+1, G*H)
    return {'cw0': cw0, 'cw': cw, 'rw': rw, 'bn': bn, 'fcw': raw['fcw'], 'fcb': raw['fcb']}


# ----------------------------------------------------------------------------------
# Pure-JAX reference (full-length T, mirrors the PyTorch module in eval mode)
# ----------------------------------------------------------------------------------
def reference_forward(x, raw):
    h = x.astype(jnp.float32)
    for i in range(NUM_LAYERS):
        d = 2 ** i
        res = (jnp.einsum('btc,ch->bth', h, raw['rw']) + raw['rb']) if i == 0 else h
        T = h.shape[1]
        hp = jnp.pad(h, ((0, 0), (d, d), (0, 0)))
        acc = sum(jnp.einsum('btc,ch->bth', hp[:, k * d:k * d + T, :], raw[f'w{i}'][k])
                  for k in range(KSIZE)) + raw[f'b{i}']
        scale = raw[f'g{i}'] / jnp.sqrt(raw[f'var{i}'] + BN_EPS)
        acc = (acc - raw[f'mean{i}']) * scale + raw[f'beta{i}']
        h = jnp.maximum(acc, 0.0) + res
    return h[:, -1, :] @ raw['fcw'] + raw['fcb']


if __name__ == "__main__":
    key = jax.random.PRNGKey(0)
    k1, k2, k3, k4 = jax.random.split(key, 4)

    # Test 1: small shape (B=2, T=16, C_in=4).  T(16) > receptive field (8), so the
    # trailing-window optimization is exercised and checked against the full-T ref.
    B, T, C = 2, 16, 4
    x = jax.random.normal(k1, (B, T, C), dtype=jnp.float32)
    raw = init_raw_params(k2, C)
    packed = pack_params(raw)
    out = jax.block_until_ready(advanced_tcn_forward(x, packed))
    ref = reference_forward(x, raw)
    assert out.shape == (B, 1), out.shape
    assert jnp.allclose(out, ref, atol=1e-3, rtol=1e-3), (out, ref)

    # Test 2: larger / odd sizes to exercise the multi-block grid, group padding and
    # a non-power-of-two channel count.
    B2, T2, C2 = 70, 24, 6
    x2 = jax.random.normal(k3, (B2, T2, C2), dtype=jnp.float32)
    raw2 = init_raw_params(k4, C2)
    packed2 = pack_params(raw2)
    out2 = jax.block_until_ready(advanced_tcn_forward(x2, packed2))
    ref2 = reference_forward(x2, raw2)
    assert out2.shape == (B2, 1), out2.shape
    assert jnp.allclose(out2, ref2, atol=1e-3, rtol=1e-3), \
        float(jnp.max(jnp.abs(out2 - ref2)))

    print("KERNEL_OK")
</pallas_src>

<mosaic_0001>
module attributes {stable_mosaic.version = 11 : i64} {
  func.func @tcn_kernel(%arg0: i32, %arg1: memref<1x8x16xf32, #tpu.memory_space<vmem>>, %arg2: memref<3x16x128xf32, #tpu.memory_space<vmem>>, %arg3: memref<2x3x128x128xf32, #tpu.memory_space<vmem>>, %arg4: memref<16x128xf32, #tpu.memory_space<vmem>>, %arg5: memref<7x128xf32, #tpu.memory_space<vmem>>, %arg6: memref<1x128xf32, #tpu.memory_space<vmem>>, %arg7: memref<1x24x128xf32, #tpu.memory_space<vmem>>, %arg8: memref<1x24x16xf32, #tpu.memory_space<vmem>>) attributes {dimension_semantics = [#tpu.dimension_semantics<parallel>], iteration_bounds = array<i64: 1>, scalar_prefetch = 0 : i64, scratch_operands = 2 : i64, tpu.core_type = #tpu.core_type<tc>, window_params = [{transform_indices = @transform_0, window_bounds = array<i64: 1, 8, 16>}, {pipeline_mode = #tpu.pipeline_mode<synchronous>, transform_indices = @transform_1, window_bounds = array<i64: 3, 16, 128>}, {pipeline_mode = #tpu.pipeline_mode<synchronous>, transform_indices = @transform_2, window_bounds = array<i64: 2, 3, 128, 128>}, {pipeline_mode = #tpu.pipeline_mode<synchronous>, transform_indices = @transform_3, window_bounds = array<i64: 16, 128>}, {pipeline_mode = #tpu.pipeline_mode<synchronous>, transform_indices = @transform_4, window_bounds = array<i64: 7, 128>}, {transform_indices = @transform_5, window_bounds = array<i64: 1, 128>}]} {
    %cst = arith.constant 0.000000e+00 : f32
    %0 = vector.broadcast %cst : f32 to vector<1x4x128xf32>
    %c0 = arith.constant 0 : index
    %c4 = arith.constant 4 : index
    %c0_0 = arith.constant 0 : index
    %1 = vector.load %arg7[%c0, %c4, %c0_0] : memref<1x24x128xf32, #tpu.memory_space<vmem>>, vector<1x4x128xf32>
    tpu.vector_store %arg7[%c0, %c4, %c0_0], %0 {strides = array<i32>} : memref<1x24x128xf32, #tpu.memory_space<vmem>>, vector<1x4x128xf32>,
    %cst_1 = arith.constant 0.000000e+00 : f32
    %2 = vector.broadcast %cst_1 : f32 to vector<1x4x128xf32>
    %c0_2 = arith.constant 0 : index
    %c16 = arith.constant 16 : index
    %c0_3 = arith.constant 0 : index
    %3 = vector.load %arg7[%c0_2, %c16, %c0_3] : memref<1x24x128xf32, #tpu.memory_space<vmem>>, vector<1x4x128xf32>
    tpu.vector_store %arg7[%c0_2, %c16, %c0_3], %2 {strides = array<i32>} : memref<1x24x128xf32, #tpu.memory_space<vmem>>, vector<1x4x128xf32>,
    %cst_4 = arith.constant 0.000000e+00 : f32
    %4 = vector.broadcast %cst_4 : f32 to vector<1x1x16xf32>
    %c0_5 = arith.constant 0 : index
    %c7 = arith.constant 7 : index
    %c0_6 = arith.constant 0 : index
    %5 = vector.load %arg8[%c0_5, %c7, %c0_6] : memref<1x24x16xf32, #tpu.memory_space<vmem>>, vector<1x1x16xf32>
    tpu.vector_store %arg8[%c0_5, %c7, %c0_6], %4 {strides = array<i32>} : memref<1x24x16xf32, #tpu.memory_space<vmem>>, vector<1x1x16xf32>,
    %cst_7 = arith.constant 0.000000e+00 : f32
    %6 = vector.broadcast %cst_7 : f32 to vector<1x1x16xf32>
    %c0_8 = arith.constant 0 : index
    %c16_9 = arith.constant 16 : index
    %c0_10 = arith.constant 0 : index
    %7 = vector.load %arg8[%c0_8, %c16_9, %c0_10] : memref<1x24x16xf32, #tpu.memory_space<vmem>>, vector<1x1x16xf32>
    tpu.vector_store %arg8[%c0_8, %c16_9, %c0_10], %6 {strides = array<i32>} : memref<1x24x16xf32, #tpu.memory_space<vmem>>, vector<1x1x16xf32>,
    %c0_11 = arith.constant 0 : index
    %c0_12 = arith.constant 0 : index
    %c0_13 = arith.constant 0 : index
    %8 = vector.load %arg1[%c0_11, %c0_12, %c0_13] : memref<1x8x16xf32, #tpu.memory_space<vmem>>, vector<1x8x16xf32>
    %c0_14 = arith.constant 0 : index
    %c8 = arith.constant 8 : index
    %c0_15 = arith.constant 0 : index
    %9 = vector.load %arg8[%c0_14, %c8, %c0_15] : memref<1x24x16xf32, #tpu.memory_space<vmem>>, vector<1x8x16xf32>
    tpu.vector_store %arg8[%c0_14, %c8, %c0_15], %8 {strides = array<i32>} : memref<1x24x16xf32, #tpu.memory_space<vmem>>, vector<1x8x16xf32>,
    %10 = vector.shape_cast %8 : vector<1x8x16xf32> to vector<8x16xf32>
    %c0_16 = arith.constant 0 : index
    %c0_17 = arith.constant 0 : index
    %11 = vector.load %arg4[%c0_16, %c0_17] : memref<16x128xf32, #tpu.memory_space<vmem>>, vector<16x128xf32>
    %cst_18 = arith.constant dense<0.000000e+00> : vector<8x128xf32>
    %12 = tpu.matmul %10, %11, %cst_18 {dimension_numbers = #tpu.dot_dimension_numbers<[1], [0], [0], [1], [0, 0, 1, 1], [], []>} : vector<8x16xf32>, vector<16x128xf32>, vector<8x128xf32> -> vector<8x128xf32>
    %c6 = arith.constant 6 : index
    %c0_19 = arith.constant 0 : index
    %13 = vector.load %arg5[%c6, %c0_19] : memref<7x128xf32, #tpu.memory_space<vmem>>, vector<1x128xf32>
    %14 = vector.broadcast %13 : vector<1x128xf32> to vector<8x128xf32>
    %15 = arith.addf %12, %14 : vector<8x128xf32>
    %cst_20 = arith.constant 0.000000e+00 : f32
    %16 = vector.broadcast %cst_20 : f32 to vector<8x128xf32>
    %c0_21 = arith.constant 0 : index
    %c7_22 = arith.constant 7 : index
    %c0_23 = arith.constant 0 : index
    %17 = vector.load %arg8[%c0_21, %c7_22, %c0_23] : memref<1x24x16xf32, #tpu.memory_space<vmem>>, vector<1x8x16xf32>
    %18 = vector.shape_cast %17 : vector<1x8x16xf32> to vector<8x16xf32>
    %c0_24 = arith.constant 0 : index
    %c0_25 = arith.constant 0 : index
    %c0_26 = arith.constant 0 : index
    %19 = vector.load %arg2[%c0_24, %c0_25, %c0_26] : memref<3x16x128xf32, #tpu.memory_space<vmem>>, vector<1x16x128xf32>
    %20 = vector.shape_cast %19 : vector<1x16x128xf32> to vector<16x128xf32>
    %cst_27 = arith.constant dense<0.000000e+00> : vector<8x128xf32>
    %21 = tpu.matmul %18, %20, %cst_27 {dimension_numbers = #tpu.dot_dimension_numbers<[1], [0], [0], [1], [0, 0, 1, 1], [], []>} : vector<8x16xf32>, vector<16x128xf32>, vector<8x128xf32> -> vector<8x128xf32>
    %22 = arith.addf %16, %21 : vector<8x128xf32>
    %c0_28 = arith.constant 0 : index
    %c8_29 = arith.constant 8 : index
    %c0_30 = arith.constant 0 : index
    %23 = vector.load %arg8[%c0_28, %c8_29, %c0_30] : memref<1x24x16xf32, #tpu.memory_space<vmem>>, vector<1x8x16xf32>
    %24 = vector.shape_cast %23 : vector<1x8x16xf32> to vector<8x16xf32>
    %c1 = arith.constant 1 : index
    %c0_31 = arith.constant 0 : index
    %c0_32 = arith.constant 0 : index
    %25 = vector.load %arg2[%c1, %c0_31, %c0_32] : memref<3x16x128xf32, #tpu.memory_space<vmem>>, vector<1x16x128xf32>
    %26 = vector.shape_cast %25 : vector<1x16x128xf32> to vector<16x128xf32>
    %cst_33 = arith.constant dense<0.000000e+00> : vector<8x128xf32>
    %27 = tpu.matmul %24, %26, %cst_33 {dimension_numbers = #tpu.dot_dimension_numbers<[1], [0], [0], [1], [0, 0, 1, 1], [], []>} : vector<8x16xf32>, vector<16x128xf32>, vector<8x128xf32> -> vector<8x128xf32>
    %28 = arith.addf %22, %27 : vector<8x128xf32>
    %c0_34 = arith.constant 0 : index
    %c9 = arith.constant 9 : index
    %c0_35 = arith.constant 0 : index
    %29 = vector.load %arg8[%c0_34, %c9, %c0_35] : memref<1x24x16xf32, #tpu.memory_space<vmem>>, vector<1x8x16xf32>
    %30 = vector.shape_cast %29 : vector<1x8x16xf32> to vector<8x16xf32>
    %c2 = arith.constant 2 : index
    %c0_36 = arith.constant 0 : index
    %c0_37 = arith.constant 0 : index
    %31 = vector.load %arg2[%c2, %c0_36, %c0_37] : memref<3x16x128xf32, #tpu.memory_space<vmem>>, vector<1x16x128xf32>
    %32 = vector.shape_cast %31 : vector<1x16x128xf32> to vector<16x128xf32>
    %cst_38 = arith.constant dense<0.000000e+00> : vector<8x128xf32>
    %33 = tpu.matmul %30, %32, %cst_38 {dimension_numbers = #tpu.dot_dimension_numbers<[1], [0], [0], [1], [0, 0, 1, 1], [], []>} : vector<8x16xf32>, vector<16x128xf32>, vector<8x128xf32> -> vector<8x128xf32>
    %34 = arith.addf %28, %33 : vector<8x128xf32>
    %c0_39 = arith.constant 0 : index
    %c0_40 = arith.constant 0 : index
    %35 = vector.load %arg5[%c0_39, %c0_40] : memref<7x128xf32, #tpu.memory_space<vmem>>, vector<1x128xf32>
    %36 = vector.broadcast %35 : vector<1x128xf32> to vector<8x128xf32>
    %37 = arith.mulf %34, %36 : vector<8x128xf32>
    %c3 = arith.constant 3 : index
    %c0_41 = arith.constant 0 : index
    %38 = vector.load %arg5[%c3, %c0_41] : memref<7x128xf32, #tpu.memory_space<vmem>>, vector<1x128xf32>
    %39 = vector.broadcast %38 : vector<1x128xf32> to vector<8x128xf32>
    %40 = arith.addf %37, %39 : vector<8x128xf32>
    %cst_42 = arith.constant 0.000000e+00 : f32
    %41 = vector.broadcast %cst_42 : f32 to vector<8x128xf32>
    %42 = arith.maximumf %40, %41 : vector<8x128xf32>
    %43 = arith.addf %42, %15 : vector<8x128xf32>
    %44 = vector.shape_cast %43 : vector<8x128xf32> to vector<1x8x128xf32>
    %c0_43 = arith.constant 0 : index
    %c8_44 = arith.constant 8 : index
    %c0_45 = arith.constant 0 : index
    %45 = vector.load %arg7[%c0_43, %c8_44, %c0_45] : memref<1x24x128xf32, #tpu.memory_space<vmem>>, vector<1x8x128xf32>
    tpu.vector_store %arg7[%c0_43, %c8_44, %c0_45], %44 {strides = array<i32>} : memref<1x24x128xf32, #tpu.memory_space<vmem>>, vector<1x8x128xf32>,
    %cst_46 = arith.constant 0.000000e+00 : f32
    %46 = vector.broadcast %cst_46 : f32 to vector<8x128xf32>
    %c0_47 = arith.constant 0 : index
    %c6_48 = arith.constant 6 : index
    %c0_49 = arith.constant 0 : index
    %47 = vector.load %arg7[%c0_47, %c6_48, %c0_49] : memref<1x24x128xf32, #tpu.memory_space<vmem>>, vector<1x8x128xf32>
    %48 = vector.shape_cast %47 : vector<1x8x128xf32> to vector<8x128xf32>
    %c0_50 = arith.constant 0 : index
    %c0_51 = arith.constant 0 : index
    %c0_52 = arith.constant 0 : index
    %c0_53 = arith.constant 0 : index
    %49 = vector.load %arg3[%c0_50, %c0_51, %c0_52, %c0_53] : memref<2x3x128x128xf32, #tpu.memory_space<vmem>>, vector<1x1x128x128xf32>
    %50 = vector.shape_cast %49 : vector<1x1x128x128xf32> to vector<128x128xf32>
    %cst_54 = arith.constant dense<0.000000e+00> : vector<8x128xf32>
    %51 = tpu.matmul %48, %50, %cst_54 {dimension_numbers = #tpu.dot_dimension_numbers<[1], [0], [0], [1], [0, 0, 1, 1], [], []>} : vector<8x128xf32>, vector<128x128xf32>, vector<8x128xf32> -> vector<8x128xf32>
    %52 = arith.addf %46, %51 : vector<8x128xf32>
    %c0_55 = arith.constant 0 : index
    %c8_56 = arith.constant 8 : index
    %c0_57 = arith.constant 0 : index
    %53 = vector.load %arg7[%c0_55, %c8_56, %c0_57] : memref<1x24x128xf32, #tpu.memory_space<vmem>>, vector<1x8x128xf32>
    %54 = vector.shape_cast %53 : vector<1x8x128xf32> to vector<8x128xf32>
    %c0_58 = arith.constant 0 : index
    %c1_59 = arith.constant 1 : index
    %c0_60 = arith.constant 0 : index
    %c0_61 = arith.constant 0 : index
    %55 = vector.load %arg3[%c0_58, %c1_59, %c0_60, %c0_61] : memref<2x3x128x128xf32, #tpu.memory_space<vmem>>, vector<1x1x128x128xf32>
    %56 = vector.shape_cast %55 : vector<1x1x128x128xf32> to vector<128x128xf32>
    %cst_62 = arith.constant dense<0.000000e+00> : vector<8x128xf32>
    %57 = tpu.matmul %54, %56, %cst_62 {dimension_numbers = #tpu.dot_dimension_numbers<[1], [0], [0], [1], [0, 0, 1, 1], [], []>} : vector<8x128xf32>, vector<128x128xf32>, vector<8x128xf32> -> vector<8x128xf32>
    %58 = arith.addf %52, %57 : vector<8x128xf32>
    %c0_63 = arith.constant 0 : index
    %c10 = arith.constant 10 : index
    %c0_64 = arith.constant 0 : index
    %59 = vector.load %arg7[%c0_63, %c10, %c0_64] : memref<1x24x128xf32, #tpu.memory_space<vmem>>, vector<1x8x128xf32>
    %60 = vector.shape_cast %59 : vector<1x8x128xf32> to vector<8x128xf32>
    %c0_65 = arith.constant 0 : index
    %c2_66 = arith.constant 2 : index
    %c0_67 = arith.constant 0 : index
    %c0_68 = arith.constant 0 : index
    %61 = vector.load %arg3[%c0_65, %c2_66, %c0_67, %c0_68] : memref<2x3x128x128xf32, #tpu.memory_space<vmem>>, vector<1x1x128x128xf32>
    %62 = vector.shape_cast %61 : vector<1x1x128x128xf32> to vector<128x128xf32>
    %cst_69 = arith.constant dense<0.000000e+00> : vector<8x128xf32>
    %63 = tpu.matmul %60, %62, %cst_69 {dimension_numbers = #tpu.dot_dimension_numbers<[1], [0], [0], [1], [0, 0, 1, 1], [], []>} : vector<8x128xf32>, vector<128x128xf32>, vector<8x128xf32> -> vector<8x128xf32>
    %64 = arith.addf %58, %63 : vector<8x128xf32>
    %c1_70 = arith.constant 1 : index
    %c0_71 = arith.constant 0 : index
    %65 = vector.load %arg5[%c1_70, %c0_71] : memref<7x128xf32, #tpu.memory_space<vmem>>, vector<1x128xf32>
    %66 = vector.broadcast %65 : vector<1x128xf32> to vector<8x128xf32>
    %67 = arith.mulf %64, %66 : vector<8x128xf32>
    %c4_72 = arith.constant 4 : index
    %c0_73 = arith.constant 0 : index
    %68 = vector.load %arg5[%c4_72, %c0_73] : memref<7x128xf32, #tpu.memory_space<vmem>>, vector<1x128xf32>
    %69 = vector.broadcast %68 : vector<1x128xf32> to vector<8x128xf32>
    %70 = arith.addf %67, %69 : vector<8x128xf32>
    %cst_74 = arith.constant 0.000000e+00 : f32
    %71 = vector.broadcast %cst_74 : f32 to vector<8x128xf32>
    %72 = arith.maximumf %70, %71 : vector<8x128xf32>
    %73 = arith.addf %72, %43 : vector<8x128xf32>
    %74 = vector.shape_cast %73 : vector<8x128xf32> to vector<1x8x128xf32>
    %c0_75 = arith.constant 0 : index
    %c8_76 = arith.constant 8 : index
    %c0_77 = arith.constant 0 : index
    %75 = vector.load %arg7[%c0_75, %c8_76, %c0_77] : memref<1x24x128xf32, #tpu.memory_space<vmem>>, vector<1x8x128xf32>
    tpu.vector_store %arg7[%c0_75, %c8_76, %c0_77], %74 {strides = array<i32>} : memref<1x24x128xf32, #tpu.memory_space<vmem>>, vector<1x8x128xf32>,
    %cst_78 = arith.constant 0.000000e+00 : f32
    %76 = vector.broadcast %cst_78 : f32 to vector<8x128xf32>
    %c0_79 = arith.constant 0 : index
    %c4_80 = arith.constant 4 : index
    %c0_81 = arith.constant 0 : index
    %77 = vector.load %arg7[%c0_79, %c4_80, %c0_81] : memref<1x24x128xf32, #tpu.memory_space<vmem>>, vector<1x8x128xf32>
    %78 = vector.shape_cast %77 : vector<1x8x128xf32> to vector<8x128xf32>
    %c1_82 = arith.constant 1 : index
    %c0_83 = arith.constant 0 : index
    %c0_84 = arith.constant 0 : index
    %c0_85 = arith.constant 0 : index
    %79 = vector.load %arg3[%c1_82, %c0_83, %c0_84, %c0_85] : memref<2x3x128x128xf32, #tpu.memory_space<vmem>>, vector<1x1x128x128xf32>
    %80 = vector.shape_cast %79 : vector<1x1x128x128xf32> to vector<128x128xf32>
    %cst_86 = arith.constant dense<0.000000e+00> : vector<8x128xf32>
    %81 = tpu.matmul %78, %80, %cst_86 {dimension_numbers = #tpu.dot_dimension_numbers<[1], [0], [0], [1], [0, 0, 1, 1], [], []>} : vector<8x128xf32>, vector<128x128xf32>, vector<8x128xf32> -> vector<8x128xf32>
    %82 = arith.addf %76, %81 : vector<8x128xf32>
    %c0_87 = arith.constant 0 : index
    %c8_88 = arith.constant 8 : index
    %c0_89 = arith.constant 0 : index
    %83 = vector.load %arg7[%c0_87, %c8_88, %c0_89] : memref<1x24x128xf32, #tpu.memory_space<vmem>>, vector<1x8x128xf32>
    %84 = vector.shape_cast %83 : vector<1x8x128xf32> to vector<8x128xf32>
    %c1_90 = arith.constant 1 : index
    %c1_91 = arith.constant 1 : index
    %c0_92 = arith.constant 0 : index
    %c0_93 = arith.constant 0 : index
    %85 = vector.load %arg3[%c1_90, %c1_91, %c0_92, %c0_93] : memref<2x3x128x128xf32, #tpu.memory_space<vmem>>, vector<1x1x128x128xf32>
    %86 = vector.shape_cast %85 : vector<1x1x128x128xf32> to vector<128x128xf32>
    %cst_94 = arith.constant dense<0.000000e+00> : vector<8x128xf32>
    %87 = tpu.matmul %84, %86, %cst_94 {dimension_numbers = #tpu.dot_dimension_numbers<[1], [0], [0], [1], [0, 0, 1, 1], [], []>} : vector<8x128xf32>, vector<128x128xf32>, vector<8x128xf32> -> vector<8x128xf32>
    %88 = arith.addf %82, %87 : vector<8x128xf32>
    %c0_95 = arith.constant 0 : index
    %c12 = arith.constant 12 : index
    %c0_96 = arith.constant 0 : index
    %89 = vector.load %arg7[%c0_95, %c12, %c0_96] : memref<1x24x128xf32, #tpu.memory_space<vmem>>, vector<1x8x128xf32>
    %90 = vector.shape_cast %89 : vector<1x8x128xf32> to vector<8x128xf32>
    %c1_97 = arith.constant 1 : index
    %c2_98 = arith.constant 2 : index
    %c0_99 = arith.constant 0 : index
    %c0_100 = arith.constant 0 : index
    %91 = vector.load %arg3[%c1_97, %c2_98, %c0_99, %c0_100] : memref<2x3x128x128xf32, #tpu.memory_space<vmem>>, vector<1x1x128x128xf32>
    %92 = vector.shape_cast %91 : vector<1x1x128x128xf32> to vector<128x128xf32>
    %cst_101 = arith.constant dense<0.000000e+00> : vector<8x128xf32>
    %93 = tpu.matmul %90, %92, %cst_101 {dimension_numbers = #tpu.dot_dimension_numbers<[1], [0], [0], [1], [0, 0, 1, 1], [], []>} : vector<8x128xf32>, vector<128x128xf32>, vector<8x128xf32> -> vector<8x128xf32>
    %94 = arith.addf %88, %93 : vector<8x128xf32>
    %c2_102 = arith.constant 2 : index
    %c0_103 = arith.constant 0 : index
    %95 = vector.load %arg5[%c2_102, %c0_103] : memref<7x128xf32, #tpu.memory_space<vmem>>, vector<1x128xf32>
    %96 = vector.broadcast %95 : vector<1x128xf32> to vector<8x128xf32>
    %97 = arith.mulf %94, %96 : vector<8x128xf32>
    %c5 = arith.constant 5 : index
    %c0_104 = arith.constant 0 : index
    %98 = vector.load %arg5[%c5, %c0_104] : memref<7x128xf32, #tpu.memory_space<vmem>>, vector<1x128xf32>
    %99 = vector.broadcast %98 : vector<1x128xf32> to vector<8x128xf32>
    %100 = arith.addf %97, %99 : vector<8x128xf32>
    %cst_105 = arith.constant 0.000000e+00 : f32
    %101 = vector.broadcast %cst_105 : f32 to vector<8x128xf32>
    %102 = arith.maximumf %100, %101 : vector<8x128xf32>
    %103 = arith.addf %102, %73 : vector<8x128xf32>
    %104 = vector.shape_cast %103 : vector<8x128xf32> to vector<1x8x128xf32>
    %105 = vector.extract_strided_slice %104 {offsets = [0, 7, 0], sizes = [1, 1, 128], strides = [1, 1, 1]} : vector<1x8x128xf32> to vector<1x1x128xf32>
    %106 = vector.shape_cast %105 : vector<1x1x128xf32> to vector<1x128xf32>
    %c0_106 = arith.constant 0 : index
    %c0_107 = arith.constant 0 : index
    %107 = vector.load %arg6[%c0_106, %c0_107] : memref<1x128xf32, #tpu.memory_space<vmem>>, vector<1x128xf32>
    tpu.vector_store %arg6[%c0_106, %c0_107], %106 {strides = array<i32>} : memref<1x128xf32, #tpu.memory_space<vmem>>, vector<1x128xf32>,
    return
  }
  func.func @transform_0(%arg0: i32) -> (i32, i32, i32) {
    %c0_i32 = arith.constant 0 : i32
    %c0_i32_0 = arith.constant 0 : i32
    %c0_i32_1 = arith.constant 0 : i32
    return %arg0, %c0_i32, %c0_i32_0 : i32, i32, i32
  }
  func.func @transform_1(%arg0: i32) -> (i32, i32, i32) {
    %c0_i32 = arith.constant 0 : i32
    %c0_i32_0 = arith.constant 0 : i32
    %c0_i32_1 = arith.constant 0 : i32
    %c0_i32_2 = arith.constant 0 : i32
    return %c0_i32, %c0_i32_0, %c0_i32_1 : i32, i32, i32
  }
  func.func @transform_2(%arg0: i32) -> (i32, i32, i32, i32) {
    %c0_i32 = arith.constant 0 : i32
    %c0_i32_0 = arith.constant 0 : i32
    %c0_i32_1 = arith.constant 0 : i32
    %c0_i32_2 = arith.constant 0 : i32
    %c0_i32_3 = arith.constant 0 : i32
    return %c0_i32, %c0_i32_0, %c0_i32_1, %c0_i32_2 : i32, i32, i32, i32
  }
  func.func @transform_3(%arg0: i32) -> (i32, i32) {
    %c0_i32 = arith.constant 0 : i32
    %c0_i32_0 = arith.constant 0 : i32
    %c0_i32_1 = arith.constant 0 : i32
    return %c0_i32, %c0_i32_0 : i32, i32
  }
  func.func @transform_4(%arg0: i32) -> (i32, i32) {
    %c0_i32 = arith.constant 0 : i32
    %c0_i32_0 = arith.constant 0 : i32
    %c0_i32_1 = arith.constant 0 : i32
    return %c0_i32, %c0_i32_0 : i32, i32
  }
  func.func @transform_5(%arg0: i32) -> (i32, i32) {
    %c0_i32 = arith.constant 0 : i32
    %c0_i32_0 = arith.constant 0 : i32
    return %arg0, %c0_i32 : i32, i32
  }
}

</mosaic_0001>

<bundles_post_ra>
// kernel: tpu_custom_call.1
= control target key start
LH: loop header
LB: loop body
LE: loop exit
PB: predicated region body
PF: predicated region fallthrough
CT: control target
= control target key end

     0   :  { %10 = vsyncpa [#allocation5], 0  ;;  %s1863_s0 = inlined_call_operand.hbm [shape: f32[1,8,16], index: 0, kind: input, shape index: {}]   ;;  %s1864_s1 = inlined_call_operand.hbm [shape: f32[3,16,128], index: 1, kind: input, shape index: {}]   ;;  %s1865_s2 = inlined_call_operand.hbm [shape: f32[2,3,128,128], index: 2, kind: input, shape index: {}]   ;;  %s1866_s3 = inlined_call_operand.hbm [shape: f32[16,128], index: 3, kind: input, shape index: {}]   ;;  %s1867_s4 = inlined_call_operand.vmem [shape: f32[7,128], index: 4, kind: input, shape index: {}]   ;;  %s1868_s5 = inlined_call_operand.hbm [shape: f32[1,128], index: 5, kind: output, shape index: {}]  }
   0x1   :  { %11 = vsyncpa [#allocation8], 0 }
   0x2   :  { %12 = vsyncpa [#allocation11], 0 }
   0x3   :  { %13 = vsyncpa [#allocation6], 0  ;;  %s1642_s18 = smov [#allocation7]   ;;  %s1524_s22 = scalar_lea.hbm %s1864_s1, 768 }
   0x4   :  { %s29_s19 = sshll.u32 %s1642_s18, 4  ;;  %p1525_p0 = scmp.ne.s32.totalorder %s1864_s1, %s1524_s22  ;;  %s30_s19 = int_to_ptr.vmem [resolvable:$true] %s29_s19 }
   0x5   :  { %p1528_p1 = scmp.lt.u32.totalorder %s1524_s22, %s1864_s1 }
   0x7   :  { %p1530_p2 = pnand %p1528_p1, %p1525_p0 }
   0x9   :  { %1533 = shalt.err (!%p1530_p2)
}
   0xa   :  { %s1534_s27 = scalar_lea.vmem %s30_s19, 768  ;;  %p1539_p4 = scmp.lt.s32.totalorder %s30_s19, %s30_s19 }
   0xb   :  { %p1535_p3 = scmp.ne.s32.totalorder %s30_s19, %s1534_s27  ;;  %p1540_p5 = scmp.lt.s32.totalorder %s1534_s27, %s1534_s27 }
   0xd   :  { %p1541_p6 = por %p1540_p5, %p1539_p4 }
   0xf   :  { %p1542_p7 = pnand %p1541_p6, %p1535_p3 }
  0x11   :  { %1545 = shalt.err (!%p1542_p7)
}
  0x12   :  { %s1643_s28 = smov 128   ;;  %s1644_s29 = smov 8  }
  0x13   :  { %35 = dma.hbm_to_vmem [thread:$0]  %s1864_s1, 768, %s30_s19, [#allocation8], %s1643_s28, %s1643_s28, %s1644_s29  }
  0x14   :  { %s1645_s7 = smov [#allocation4]   ;;  %s1646_s9 = smov [#allocation9]  }
  0x15   :  { %s20_s8 = sshll.u32 %s1645_s7, 4  ;;  %s41_s10 = sshll.u32 %s1646_s9, 4  ;;  %s21_s8 = int_to_ptr.vmem [resolvable:$true] %s20_s8  ;;  %s42_s10 = int_to_ptr.vmem [resolvable:$true] %s41_s10 }
  0x16   :  { %s1546_s13 = scalar_lea.hbm %s1863_s0, 128 }
  0x17   :  { %p1547_p8 = scmp.ne.s32.totalorder %s1863_s0, %s1546_s13  ;;  %p1550_p9 = scmp.lt.u32.totalorder %s1546_s13, %s1863_s0 }
  0x19   :  { %p1552_p10 = pnand %p1550_p9, %p1547_p8 }
  0x1b   :  { %1555 = shalt.err (!%p1552_p10)
}
  0x1c   :  { %s1556_s1 = scalar_lea.vmem %s21_s8, 128  ;;  %p1561_p12 = scmp.lt.s32.totalorder %s21_s8, %s21_s8 }
  0x1d   :  { %p1557_p11 = scmp.ne.s32.totalorder %s21_s8, %s1556_s1  ;;  %p1562_p13 = scmp.lt.s32.totalorder %s1556_s1, %s1556_s1 }
  0x1f   :  { %p1563_p0 = por %p1562_p13, %p1561_p12 }
  0x21   :  { %p1564_p1 = pnand %p1563_p0, %p1557_p11 }
  0x23   :  { %1567 = shalt.err (!%p1564_p1)
}
  0x24   :  { %23 = dma.hbm_to_vmem [thread:$0]  %s1863_s0, 128, %s21_s8, [#allocation5]  }
  0x25   :  { %s1568_s22 = scalar_lea.hbm %s1865_s2, 12288 }
  0x26   :  { %p1569_p2 = scmp.ne.s32.totalorder %s1865_s2, %s1568_s22  ;;  %p1572_p3 = scmp.lt.u32.totalorder %s1568_s22, %s1865_s2 }
  0x28   :  { %p1574_p4 = pnand %p1572_p3, %p1569_p2 }
  0x2a   :  { %1577 = shalt.err (!%p1574_p4)
}
  0x2b   :  { %s1578_s27 = scalar_lea.vmem %s42_s10, 12288  ;;  %p1583_p6 = scmp.lt.s32.totalorder %s42_s10, %s42_s10 }
  0x2c   :  { %p1579_p5 = scmp.ne.s32.totalorder %s42_s10, %s1578_s27  ;;  %p1584_p7 = scmp.lt.s32.totalorder %s1578_s27, %s1578_s27 }
  0x2e   :  { %p1585_p8 = por %p1584_p7, %p1583_p6 }
  0x30   :  { %p1586_p9 = pnand %p1585_p8, %p1579_p5 }
  0x32   :  { %1589 = shalt.err (!%p1586_p9)
}
  0x33   :  { %47 = dma.hbm_to_vmem [thread:$0]  %s1865_s2, 12288, %s42_s10, [#allocation8], %s1643_s28, %s1643_s28, %s1644_s29  }
  0x34   :  { %s1647_s6 = smov [#allocation10]   ;;  %s1590_s11 = scalar_lea.hbm %s1866_s3, 256 }
  0x35   :  { %s53_s7 = sshll.u32 %s1647_s6, 4  ;;  %p1591_p10 = scmp.ne.s32.totalorder %s1866_s3, %s1590_s11  ;;  %s54_s7 = int_to_ptr.vmem [resolvable:$true] %s53_s7 }
  0x36   :  { %p1594_p11 = scmp.lt.u32.totalorder %s1590_s11, %s1866_s3 }
  0x38   :  { %p1596_p12 = pnand %p1594_p11, %p1591_p10 }
  0x3a   :  { %1599 = shalt.err (!%p1596_p12)
}
  0x3b   :  { %s1600_s16 = scalar_lea.vmem %s54_s7, 256  ;;  %p1605_p0 = scmp.lt.s32.totalorder %s54_s7, %s54_s7 }
  0x3c   :  { %p1601_p13 = scmp.ne.s32.totalorder %s54_s7, %s1600_s16  ;;  %p1606_p1 = scmp.lt.s32.totalorder %s1600_s16, %s1600_s16 }
  0x3e   :  { %p1607_p2 = por %p1606_p1, %p1605_p0 }
  0x40   :  { %p1608_p3 = pnand %p1607_p2, %p1601_p13 }
  0x42   :  { %1611 = shalt.err (!%p1608_p3)
}
  0x43   :  { %59 = dma.hbm_to_vmem [thread:$0]  %s1866_s3, 256, %s54_s7, [#allocation11], %s1643_s28, %s1643_s28, %s1644_s29  }
  0x44   :  { %1634 = dma.done.wait [#allocation5], 128  }
  0x45   :  { %1635 = vsyncadd [#allocation5], 4294967168 }
  0x46   :  { %1636 = dma.done.wait [#allocation8], 13056  }
  0x47   :  { %1637 = vsyncadd [#allocation8], 4294954240 }
  0x48   :  { %1638 = dma.done.wait [#allocation11], 256  }
  0x49   :  { %1639 = vsyncadd [#allocation11], 4294967040  ;;  %vm76_vm0 = vcmask 122880   ;;  %v1648_v0 = vmov 0.0|0.0   ;;  %v1649_v1 = vmov 0.0   ;;  %vm1650_vm1 = vmmov 0  }
  0x4a   :  { %1353 = vmatprep.subr.bf16.mxu1 %v1648_v0  ;;  %1347 = vmatprep.subr.bf16.mxu0 %v1648_v0  ;;  %74 = vst [vmem:[#allocation2 + $0x4] sm:$0xf] %v1649_v1  ;;  %75 = vst [vmem:[#allocation2 + $0x10] sm:$0xf] %v1649_v1  ;;  %vm80_vm2 = vcmask 130048   ;;  %v163_v2 = vld [vmem:[#allocation7] sm:$0xff] }
  0x4b   :  { %77 = vst.msk [vmem:[#allocation3 + $0x7] sm:$0x1] %vm76_vm0, %v1649_v1  ;;  %78 = vst.msk [vmem:[#allocation3 + $0x10] sm:$0x1] %vm76_vm0, %v1649_v1  ;;  %1127 = vmatprep.mubr.msk.f32.mxu1 %vm1650_vm1, %v1649_v1  ;;  %1113 = vmatprep.mubr.msk.f32.mxu0 %vm1650_vm1, %v1649_v1  ;;  %v164_v3 = vld [vmem:[#allocation7 + $0x8] sm:$0xff]  ;;  %v82_v4 = vld [vmem:[#allocation10] sm:$0xff] }
  0x4c   :  { %v1354_v5 = vpack.c.bf16 %v164_v3, %v163_v2  ;;  %v83_v6 = vld [vmem:[#allocation10 + $0x8] sm:$0xff]  ;;  %v167_v9 = vld [vmem:[#allocation7 + $0x10] sm:$0xff]  ;;  %v317_v11 = vld [vmem:[#allocation7 + $0x20] sm:$0xff]  ;;  %s1651_s27 = smov [#allocation12]  }
  0x4d   :  { %v79_v7 = vld [vmem:[#allocation4] sm:$0xff]  ;;  %v1348_v8 = vpack.c.bf16 %v83_v6, %v82_v4  ;;  %v318_v12 = vld [vmem:[#allocation7 + $0x28] sm:$0xff]  ;;  %v427_v14 = vld [vmem:[#allocation9 + $0x80] sm:$0xff]  ;;  %s973_s0 = sshll.u32 %s1651_s27, 4  ;;  %s974_s0 = int_to_ptr.vmem [resolvable:$true] %s973_s0 }
  0x4e   :  { %81 = vst.msk [vmem:[#allocation3 + $0x8] sm:$0xff] %vm80_vm2, %v79_v7  ;;  %v168_v10 = vld [vmem:[#allocation7 + $0x18] sm:$0xff]  ;;  %1355 = vmatpush3.bf16.msra.mxu1 %v1354_v5  ;;  %v1357_v16 = vpack.c.bf16 %v318_v12, %v317_v11  ;;  %v429_v18 = vld [vmem:[#allocation9 + $0x90] sm:$0xff]  ;;  %v430_v21 = vld [vmem:[#allocation9 + $0x98] sm:$0xff]  ;;  %s1612_s30 = scalar_lea.vmem %s974_s0, 16  ;;  %s1616_s6 = scalar_lea.vmem %s974_s0, 32 }
  0x4f   :  { %1356 = vmatprep.subr.bf16.mxu1 %v1648_v0  ;;  %1349 = vmatpush3.bf16.msra.mxu0 %v1348_v8  ;;  %v1351_v13 = vpack.c.bf16 %v168_v10, %v167_v9  ;;  %v428_v15 = vld [vmem:[#allocation9 + $0x88] sm:$0xff]  ;;  %v1363_v22 = vpack.c.bf16 %v430_v21, %v429_v18  ;;  %v431_v24 = vld [vmem:[#allocation9 + $0xa0] sm:$0xff]  ;;  %v433_v27 = vld [vmem:[#allocation9 + $0xb0] sm:$0xff]  ;;  %p1613_p4 = scmp.ne.s32.totalorder %s974_s0, %s1612_s30  ;;  %p1617_p5 = scmp.lt.s32.totalorder %s974_s0, %s974_s0 }
  0x50   :  { %1350 = vmatprep.subr.bf16.mxu0 %v1648_v0  ;;  %v1360_v17 = vpack.c.bf16 %v428_v15, %v427_v14  ;;  %v432_v25 = vld [vmem:[#allocation9 + $0xa8] sm:$0xff]  ;;  %v434_v28 = vld [vmem:[#allocation9 + $0xb8] sm:$0xff]  ;;  %v435_v30 = vld [vmem:[#allocation9 + $0xc0] sm:$0xff]  ;;  %p1618_p6 = scmp.lt.s32.totalorder %s1616_s6, %s1612_s30 }
  0x51   :  { %v1366_v26 = vpack.c.bf16 %v432_v25, %v431_v24  ;;  %v1369_v29 = vpack.c.bf16 %v434_v28, %v433_v27  ;;  %v436_v31 = vld [vmem:[#allocation9 + $0xc8] sm:$0xff]  ;;  %v437_v33 = vld [vmem:[#allocation9 + $0xd0] sm:$0xff]  ;;  %v438_v34 = vld [vmem:[#allocation9 + $0xd8] sm:$0xff] }
  0x52   :  { %1114 = vmatmul.mubr.msk.f32.vlgmr.msra.gmra.mrb[0].mxu0 %vm80_vm2, %v79_v7  ;;  %v1372_v32 = vpack.c.bf16 %v436_v31, %v435_v30  ;;  %v1375_v35 = vpack.c.bf16 %v438_v34, %v437_v33  ;;  %v439_v36 = vld [vmem:[#allocation9 + $0xe0] sm:$0xff]  ;;  %v440_v37 = vld [vmem:[#allocation9 + $0xe8] sm:$0xff]  ;;  %v441_v39 = vld [vmem:[#allocation9 + $0xf0] sm:$0xff]  ;;  %p1619_p7 = por %p1618_p6, %p1617_p5 }
  0x53   :  { %1352 = vmatpush3.bf16.msra.mxu0 %v1351_v13  ;;  %1120 = vmatprep.mubr.msk.f32.mxu0 %vm1650_vm1, %v1649_v1  ;;  %v1378_v38 = vpack.c.bf16 %v440_v37, %v439_v36  ;;  %v442_v40 = vld [vmem:[#allocation9 + $0xf8] sm:$0xff]  ;;  %v707_v42 = vld [vmem:[#allocation9 + $0x200] sm:$0xff]  ;;  %v708_v43 = vld [vmem:[#allocation9 + $0x208] sm:$0xff] }
  0x54   :  { %1359 = vmatprep.subr.bf16.mxu0 %v1648_v0  ;;  %v1381_v41 = vpack.c.bf16 %v442_v40, %v441_v39  ;;  %v709_v44 = vld [vmem:[#allocation9 + $0x210] sm:$0xff]  ;;  %v1432_v45 = vpack.c.bf16 %v708_v43, %v707_v42  ;;  %v710_v46 = vld [vmem:[#allocation9 + $0x218] sm:$0xff]  ;;  %v711_v48 = vld [vmem:[#allocation9 + $0x220] sm:$0xff]  ;;  %p1620_p8 = pnand %p1619_p7, %p1613_p4 }
  0x55   :  { %v162_v19 = vld [vmem:[#allocation3 + $0x7] sm:$0xff]  ;;  %v1435_v47 = vpack.c.bf16 %v710_v46, %v709_v44  ;;  %v712_v49 = vld [vmem:[#allocation9 + $0x228] sm:$0xff]  ;;  %v409_v4 = vld [vmem:[#allocation9] sm:$0xff] }
  0x56   :  { %v165_v20 = vld [vmem:[#allocation3 + $0x8] sm:$0xff]  ;;  %1128 = vmatmul.mubr.msk.f32.vlgmr.msra.gmra.mrb[0].mxu1 %vm80_vm2, %v162_v19  ;;  %v1438_v50 = vpack.c.bf16 %v712_v49, %v711_v48  ;;  %v713_v51 = vld [vmem:[#allocation9 + $0x230] sm:$0xff]  ;;  %v410_v5 = vld [vmem:[#allocation9 + $0x8] sm:$0xff] }
  0x57   :  { %1358 = vmatpush3.bf16.msra.mxu1 %v1357_v16  ;;  %1121 = vmatmul.mubr.msk.f32.vlgmr.msra.gmra.mrb[2].mxu0 %vm80_vm2, %v165_v20  ;;  %v315_v23 = vld [vmem:[#allocation3 + $0x9] sm:$0xff]  ;;  %v989_v59 = vld [vmem:[%s1867_s4] ss:$0 sm:$0xff]  ;;  %v1384_v8 = vpack.c.bf16 %v410_v5, %v409_v4  ;;  %v411_v10 = vld [vmem:[#allocation9 + $0x10] sm:$0xff] }
  0x58   :  { %1134 = vmatprep.mubr.msk.f32.mxu1 %vm1650_vm1, %v1649_v1  ;;  %1361 = vmatpush3.bf16.msra.mxu0 %v1360_v17  ;;  %v714_v52 = vld [vmem:[#allocation9 + $0x238] sm:$0xff]  ;;  %v413_v13 = vld [vmem:[#allocation9 + $0x20] sm:$0xff]  ;;  %v414_v14 = vld [vmem:[#allocation9 + $0x28] sm:$0xff] }
  0x59   :  { %1362 = vmatprep.subr.bf16.mxu0 %v1648_v0  ;;  %1169 = vmatprep.mubr.msk.f32.mxu0 %vm1650_vm1, %v1649_v1  ;;  %v1441_v53 = vpack.c.bf16 %v714_v52, %v713_v51  ;;  %v990_v62 = vld [vmem:[%s1867_s4 + $0x3] ss:$0 sm:$0xff]  ;;  %v984_v2 = vld [vmem:[%s1867_s4 + $0x6] ss:$0 sm:$0xff]  ;;  %v1390_v15 = vpack.c.bf16 %v414_v14, %v413_v13  ;;  %v415_v16 = vld [vmem:[#allocation9 + $0x30] sm:$0xff] }
  0x5a   :  { %1431 = vmatprep.subr.bf16.mxu1 %v1648_v0  ;;  %v412_v11 = vld [vmem:[#allocation9 + $0x18] sm:$0xff]  ;;  %v417_v19 = vld [vmem:[#allocation9 + $0x40] sm:$0xff]  ;;  %v418_v20 = vld [vmem:[#allocation9 + $0x48] sm:$0xff] }
  0x5b   :  { %v1387_v12 = vpack.c.bf16 %v412_v11, %v411_v10  ;;  %v416_v17 = vld [vmem:[#allocation9 + $0x38] sm:$0xff]  ;;  %v1396_v21 = vpack.c.bf16 %v418_v20, %v417_v19  ;;  %v421_v25 = vld [vmem:[#allocation9 + $0x60] sm:$0xff]  ;;  %v423_v28 = vld [vmem:[#allocation9 + $0x70] sm:$0xff] }
  0x5c   :  { %1364 = vmatpush3.bf16.msra.mxu0 %v1363_v22  ;;  %v1393_v18 = vpack.c.bf16 %v416_v17, %v415_v16  ;;  %v419_v22 = vld [vmem:[#allocation9 + $0x50] sm:$0xff]  ;;  %v585_v31 = vld [vmem:[#allocation9 + $0x100] sm:$0xff]  ;;  %v590_v39 = vld [vmem:[#allocation9 + $0x128] sm:$0xff] }
  0x5d   :  { %1365 = vmatprep.subr.bf16.mxu0 %v1648_v0  ;;  %v587_v34 = vld [vmem:[#allocation9 + $0x110] sm:$0xff]  ;;  %v592_v42 = vld [vmem:[#allocation9 + $0x138] sm:$0xff]  ;;  %v593_v44 = vld [vmem:[#allocation9 + $0x140] sm:$0xff] }
  0x5e   :  { %1135 = vmatmul.mubr.msk.f32.vlgmr.msra.gmra.mrb[0].mxu1 %vm80_vm2, %v315_v23  ;;  %v420_v23 = vld [vmem:[#allocation9 + $0x58] sm:$0xff]  ;;  %v598_v51 = vld [vmem:[#allocation9 + $0x168] sm:$0xff]  ;;  %v721_v4 = vld [vmem:[#allocation9 + $0x270] sm:$0xff] }
  0x5f   :  { %1274 = vmatprep.mubr.msk.f32.mxu1 %vm1650_vm1, %v1649_v1  ;;  %1433 = vmatpush3.bf16.msra.mxu1 %v1432_v45  ;;  %v1399_v24 = vpack.c.bf16 %v420_v23, %v419_v22  ;;  %v594_v45 = vld [vmem:[#allocation9 + $0x148] sm:$0xff]  ;;  %v596_v48 = vld [vmem:[#allocation9 + $0x158] sm:$0xff]  ;;  %v689_v14 = vld [vmem:[#allocation9 + $0x180] sm:$0xff] }
  0x60   :  { %1367 = vmatpush3.bf16.msra.mxu0 %v1366_v26  ;;  %1434 = vmatprep.subr.bf16.mxu1 %v1648_v0  ;;  %v422_v26 = vld [vmem:[#allocation9 + $0x68] sm:$0xff]  ;;  %v1420_v46 = vpack.c.bf16 %v594_v45, %v593_v44  ;;  %v722_v5 = vld [vmem:[#allocation9 + $0x278] sm:$0xff]  ;;  %v691_v19 = vld [vmem:[#allocation9 + $0x190] sm:$0xff] }
  0x61   :  { %1368 = vmatprep.subr.bf16.mxu0 %v1648_v0  ;;  %v1402_v27 = vpack.c.bf16 %v422_v26, %v421_v25  ;;  %v992_v10 = vld [vmem:[%s1867_s4 + $0x4] ss:$0 sm:$0xff]  ;;  %v693_v22 = vld [vmem:[#allocation9 + $0x1a0] sm:$0xff]  ;;  %v694_v23 = vld [vmem:[#allocation9 + $0x1a8] sm:$0xff] }
  0x62   :  { %v692_v20 = vld [vmem:[#allocation9 + $0x198] sm:$0xff] }
  0x63   :  { %1436 = vmatpush3.bf16.msra.mxu1 %v1435_v47  ;;  %v595_v47 = vld [vmem:[#allocation9 + $0x150] sm:$0xff]  ;;  %v696_v25 = vld [vmem:[#allocation9 + $0x1b8] sm:$0xff] }
  0x64   :  { %1370 = vmatpush3.bf16.msra.mxu0 %v1369_v29  ;;  %1437 = vmatprep.subr.bf16.mxu1 %v1648_v0  ;;  %v424_v29 = vld [vmem:[#allocation9 + $0x78] sm:$0xff]  ;;  %v1423_v49 = vpack.c.bf16 %v596_v48, %v595_v47  ;;  %v870_v47 = vld [vmem:[#allocation9 + $0x2a8] sm:$0xff] }
  0x65   :  { %1371 = vmatprep.subr.bf16.mxu0 %v1648_v0  ;;  %v1405_v30 = vpack.c.bf16 %v424_v29, %v423_v28  ;;  %v698_v28 = vld [vmem:[#allocation9 + $0x1c8] sm:$0xff] }
  0x67   :  { %1439 = vmatpush3.bf16.msra.mxu1 %v1438_v50  ;;  %v597_v50 = vld [vmem:[#allocation9 + $0x160] sm:$0xff] }
  0x68   :  { %1373 = vmatpush3.bf16.msra.mxu0 %v1372_v32  ;;  %1440 = vmatprep.subr.bf16.mxu1 %v1648_v0  ;;  %v586_v32 = vld [vmem:[#allocation9 + $0x108] sm:$0xff]  ;;  %v1426_v52 = vpack.c.bf16 %v598_v51, %v597_v50  ;;  %v872_v50 = vld [vmem:[#allocation9 + $0x2b8] sm:$0xff] }
  0x69   :  { %1374 = vmatprep.subr.bf16.mxu0 %v1648_v0  ;;  %v1408_v33 = vpack.c.bf16 %v586_v32, %v585_v31  ;;  %v700_v31 = vld [vmem:[#allocation9 + $0x1d8] sm:$0xff] }
  0x6b   :  { %1442 = vmatpush3.bf16.msra.mxu1 %v1441_v53  ;;  %v599_v53 = vld [vmem:[#allocation9 + $0x170] sm:$0xff] }
  0x6c   :  { %1376 = vmatpush3.bf16.msra.mxu0 %v1375_v35  ;;  %1443 = vmatprep.subr.bf16.mxu1 %v1648_v0  ;;  %v588_v35 = vld [vmem:[#allocation9 + $0x118] sm:$0xff] }
  0x6d   :  { %1377 = vmatprep.subr.bf16.mxu0 %v1648_v0  ;;  %v1411_v37 = vpack.c.bf16 %v588_v35, %v587_v34  ;;  %v702_v34 = vld [vmem:[#allocation9 + $0x1e8] sm:$0xff] }
  0x70   :  { %1379 = vmatpush3.bf16.msra.mxu0 %v1378_v38  ;;  %v589_v38 = vld [vmem:[#allocation9 + $0x120] sm:$0xff] }
  0x71   :  { %1380 = vmatprep.subr.bf16.mxu0 %v1648_v0  ;;  %v1414_v40 = vpack.c.bf16 %v590_v39, %v589_v38  ;;  %v865_v39 = vld [vmem:[#allocation9 + $0x280] sm:$0xff] }
  0x74   :  { %1382 = vmatpush3.bf16.msra.mxu0 %v1381_v41  ;;  %v591_v41 = vld [vmem:[#allocation9 + $0x130] sm:$0xff] }
  0x75   :  { %1383 = vmatprep.subr.bf16.mxu0 %v1648_v0  ;;  %v1417_v43 = vpack.c.bf16 %v592_v42, %v591_v41  ;;  %v867_v42 = vld [vmem:[#allocation9 + $0x290] sm:$0xff] }
 0x125   :  { %v158_v54 = vpop.f32.mrb[0].mxu0 }
 0x126   :  { %v1115_v55 = vpop.f32.mrb[1].mxu0  ;;  %v159_v6 = vadd.f32 %v984_v2, %v158_v54  ;;  %v600_v54 = vld [vmem:[#allocation9 + $0x178] sm:$0xff]  ;;  %v720_v2 = vld [vmem:[#allocation9 + $0x268] sm:$0xff] }
 0x127   :  { %v1429_v55 = vpack.c.bf16 %v600_v54, %v599_v53  ;;  %v874_v53 = vld [vmem:[#allocation9 + $0x2c8] sm:$0xff] }
 0x12a   :  { %v238_v56 = vpop.f32.mrb[2].mxu0 }
 0x12b   :  { %v1122_v57 = vpop.f32.mrb[3].mxu0 }
 0x12c   :  { %v715_v57 = vld [vmem:[#allocation9 + $0x240] sm:$0xff] }
 0x131   :  { %v388_v58 = vpop.f32.mrb[0].mxu1 }
 0x132   :  { %v1503_v60 = vadd.f32 %v388_v58, %v238_v56  ;;  %v1136_v61 = vpop.f32.mrb[1].mxu1  ;;  %v716_v58 = vld [vmem:[#allocation9 + $0x248] sm:$0xff] }
 0x133   :  { %v718_v61 = vld [vmem:[#allocation9 + $0x258] sm:$0xff] }
 0x134   :  { %v398_v63 = vmul.f32 %v1503_v60, %v989_v59  ;;  %v1444_v59 = vpack.c.bf16 %v716_v58, %v715_v57  ;;  %v717_v60 = vld [vmem:[#allocation9 + $0x250] sm:$0xff]  ;;  %v877_v57 = vld [vmem:[#allocation9 + $0x2e0] sm:$0xff]  ;;  %v878_v58 = vld [vmem:[#allocation9 + $0x2e8] sm:$0xff] }
 0x136   :  { %v404_v3 = vadd.f32 %v990_v62, %v398_v63  ;;  %1445 = vmatpush3.bf16.msra.mxu1 %v1444_v59  ;;  %v1447_v62 = vpack.c.bf16 %v718_v61, %v717_v60  ;;  %v719_v63 = vld [vmem:[#allocation9 + $0x260] sm:$0xff]  ;;  %v1498_v59 = vpack.c.bf16 %v878_v58, %v877_v57  ;;  %v879_v60 = vld [vmem:[#allocation9 + $0x2f0] sm:$0xff]  ;;  %v880_v61 = vld [vmem:[#allocation9 + $0x2f8] sm:$0xff] }
 0x137   :  { %1446 = vmatprep.subr.bf16.mxu1 %v1648_v0 }
 0x138   :  { %v405_v7 = vmax.f32 %v404_v3, 0.0  ;;  %v1450_v3 = vpack.c.bf16 %v720_v2, %v719_v63  ;;  %v993_v2 = vld [vmem:[%s1867_s4 + $0x2] ss:$0 sm:$0xff] }
 0x13a   :  { %v1787_v9 = vadd.f32 %v405_v7, %v159_v6  ;;  %1448 = vmatpush3.bf16.msra.mxu1 %v1447_v62  ;;  %v1453_v6 = vpack.c.bf16 %v722_v5, %v721_v4  ;;  %v991_v7 = vld [vmem:[%s1867_s4 + $0x1] ss:$0 sm:$0xff]  ;;  %v1501_v62 = vpack.c.bf16 %v880_v61, %v879_v60  ;;  %v994_v4 = vld [vmem:[%s1867_s4 + $0x5] ss:$0 sm:$0xff] }
 0x13b   :  { %1449 = vmatprep.subr.bf16.mxu1 %v1648_v0 }
 0x13c   :  { %407 = vst [vmem:[#allocation2 + $0x8] sm:$0xff] %v1787_v9  ;;  %1170 = vmatmul.mubr.f32.vlgmr.msra.gmra.mrb[4].mxu0 %v1787_v9 }
 0x13d   :  { %1385 = vmatpush3.bf16.msra.mxu0 %v1384_v8  ;;  %1204 = vmatprep.mubr.msk.f32.mxu0 %vm1650_vm1, %v1649_v1 }
 0x13e   :  { %1386 = vmatprep.subr.bf16.mxu0 %v1648_v0  ;;  %1451 = vmatpush3.bf16.msra.mxu1 %v1450_v3 }
 0x13f   :  { %1452 = vmatprep.subr.bf16.mxu1 %v1648_v0 }
 0x141   :  { %1388 = vmatpush3.bf16.msra.mxu0 %v1387_v12 }
 0x142   :  { %1389 = vmatprep.subr.bf16.mxu0 %v1648_v0  ;;  %1454 = vmatpush3.bf16.msra.mxu1 %v1453_v6 }
 0x143   :  { %v408_v36 = vld [vmem:[#allocation2 + $0x6] sm:$0xff]  ;;  %1455 = vmatprep.subr.bf16.mxu1 %v1648_v0 }
 0x144   :  { %v583_v56 = vld [vmem:[#allocation2 + $0xa] sm:$0xff] }
 0x145   :  { %1391 = vmatpush3.bf16.msra.mxu0 %v1390_v15  ;;  %v690_v15 = vld [vmem:[#allocation9 + $0x188] sm:$0xff] }
 0x146   :  { %1392 = vmatprep.subr.bf16.mxu0 %v1648_v0  ;;  %v1456_v17 = vpack.c.bf16 %v690_v15, %v689_v14 }
 0x149   :  { %1394 = vmatpush3.bf16.msra.mxu0 %v1393_v18 }
 0x14a   :  { %1395 = vmatprep.subr.bf16.mxu0 %v1648_v0 }
 0x14d   :  { %1397 = vmatpush3.bf16.msra.mxu0 %v1396_v21  ;;  %v1459_v21 = vpack.c.bf16 %v692_v20, %v691_v19 }
 0x14e   :  { %1398 = vmatprep.subr.bf16.mxu0 %v1648_v0 }
 0x151   :  { %1400 = vmatpush3.bf16.msra.mxu0 %v1399_v24  ;;  %v1462_v24 = vpack.c.bf16 %v694_v23, %v693_v22 }
 0x152   :  { %1401 = vmatprep.subr.bf16.mxu0 %v1648_v0 }
 0x155   :  { %1403 = vmatpush3.bf16.msra.mxu0 %v1402_v27  ;;  %v697_v27 = vld [vmem:[#allocation9 + $0x1c0] sm:$0xff] }
 0x156   :  { %1404 = vmatprep.subr.bf16.mxu0 %v1648_v0  ;;  %v1468_v29 = vpack.c.bf16 %v698_v28, %v697_v27 }
 0x159   :  { %1406 = vmatpush3.bf16.msra.mxu0 %v1405_v30  ;;  %v699_v30 = vld [vmem:[#allocation9 + $0x1d0] sm:$0xff] }
 0x15a   :  { %1407 = vmatprep.subr.bf16.mxu0 %v1648_v0  ;;  %v1471_v32 = vpack.c.bf16 %v700_v31, %v699_v30 }
 0x15c   :  { %1205 = vmatmul.mubr.f32.vlgmr.msra.gmra.mrb[4].mxu0 %v408_v36  ;;  %v703_v36 = vld [vmem:[#allocation9 + $0x1f0] sm:$0xff] }
 0x15d   :  { %1409 = vmatpush3.bf16.msra.mxu0 %v1408_v33  ;;  %1239 = vmatprep.mubr.msk.f32.mxu0 %vm1650_vm1, %v1649_v1  ;;  %v701_v33 = vld [vmem:[#allocation9 + $0x1e0] sm:$0xff] }
 0x15e   :  { %1410 = vmatprep.subr.bf16.mxu0 %v1648_v0  ;;  %v1474_v35 = vpack.c.bf16 %v702_v34, %v701_v33 }
 0x161   :  { %1412 = vmatpush3.bf16.msra.mxu0 %v1411_v37  ;;  %v704_v37 = vld [vmem:[#allocation9 + $0x1f8] sm:$0xff] }
 0x162   :  { %1413 = vmatprep.subr.bf16.mxu0 %v1648_v0  ;;  %v1477_v38 = vpack.c.bf16 %v704_v37, %v703_v36 }
 0x165   :  { %1415 = vmatpush3.bf16.msra.mxu0 %v1414_v40  ;;  %v866_v40 = vld [vmem:[#allocation9 + $0x288] sm:$0xff] }
 0x166   :  { %1416 = vmatprep.subr.bf16.mxu0 %v1648_v0  ;;  %v1480_v41 = vpack.c.bf16 %v866_v40, %v865_v39 }
 0x169   :  { %1418 = vmatpush3.bf16.msra.mxu0 %v1417_v43  ;;  %v868_v43 = vld [vmem:[#allocation9 + $0x298] sm:$0xff] }
 0x16a   :  { %1419 = vmatprep.subr.bf16.mxu0 %v1648_v0  ;;  %v1483_v45 = vpack.c.bf16 %v868_v43, %v867_v42 }
 0x16d   :  { %1421 = vmatpush3.bf16.msra.mxu0 %v1420_v46  ;;  %v869_v46 = vld [vmem:[#allocation9 + $0x2a0] sm:$0xff] }
 0x16e   :  { %1422 = vmatprep.subr.bf16.mxu0 %v1648_v0  ;;  %v1486_v48 = vpack.c.bf16 %v870_v47, %v869_v46 }
 0x171   :  { %1424 = vmatpush3.bf16.msra.mxu0 %v1423_v49  ;;  %v871_v49 = vld [vmem:[#allocation9 + $0x2b0] sm:$0xff] }
 0x172   :  { %1425 = vmatprep.subr.bf16.mxu0 %v1648_v0  ;;  %v1489_v51 = vpack.c.bf16 %v872_v50, %v871_v49 }
 0x175   :  { %1427 = vmatpush3.bf16.msra.mxu0 %v1426_v52  ;;  %v873_v52 = vld [vmem:[#allocation9 + $0x2c0] sm:$0xff] }
 0x176   :  { %1428 = vmatprep.subr.bf16.mxu0 %v1648_v0  ;;  %v1492_v54 = vpack.c.bf16 %v874_v53, %v873_v52 }
 0x179   :  { %1430 = vmatpush3.bf16.msra.mxu0 %v1429_v55  ;;  %v876_v55 = vld [vmem:[#allocation9 + $0x2d8] sm:$0xff] }
 0x17c   :  { %1240 = vmatmul.mubr.f32.vlgmr.msra.gmra.mrb[4].mxu0 %v583_v56 }
 0x24f   :  { %v667_v8 = vpop.f32.mrb[4].mxu0 }
 0x250   :  { %v677_v11 = vmul.f32 %v991_v7, %v667_v8  ;;  %v1241_v12 = vpop.f32.mrb[5].mxu0 }
 0x252   :  { %v683_v13 = vadd.f32 %v992_v10, %v677_v11 }
 0x254   :  { %v684_v16 = vmax.f32 %v683_v13, 0.0 }
 0x256   :  { %v1821_v18 = vadd.f32 %v684_v16, %v1787_v9  ;;  %v695_v9 = vld [vmem:[#allocation9 + $0x1b0] sm:$0xff] }
 0x257   :  { %v1465_v26 = vpack.c.bf16 %v696_v25, %v695_v9 }
 0x258   :  { %686 = vst [vmem:[#allocation2 + $0x8] sm:$0xff] %v1821_v18  ;;  %1275 = vmatmul.mubr.f32.vlgmr.msra.gmra.mrb[2].mxu1 %v1821_v18 }
 0x259   :  { %1457 = vmatpush3.bf16.msra.mxu1 %v1456_v17  ;;  %1309 = vmatprep.mubr.msk.f32.mxu1 %vm1650_vm1, %v1649_v1 }
 0x25a   :  { %1458 = vmatprep.subr.bf16.mxu1 %v1648_v0 }
 0x25d   :  { %1460 = vmatpush3.bf16.msra.mxu1 %v1459_v21 }
 0x25e   :  { %1461 = vmatprep.subr.bf16.mxu1 %v1648_v0 }
 0x25f   :  { %v687_v44 = vld [vmem:[#allocation2 + $0x4] sm:$0xff]  ;;  %v863_v63 = vld [vmem:[#allocation2 + $0xc] sm:$0xff] }
 0x261   :  { %1463 = vmatpush3.bf16.msra.mxu1 %v1462_v24 }
 0x262   :  { %1464 = vmatprep.subr.bf16.mxu1 %v1648_v0 }
 0x265   :  { %1466 = vmatpush3.bf16.msra.mxu1 %v1465_v26 }
 0x266   :  { %1467 = vmatprep.subr.bf16.mxu1 %v1648_v0 }
 0x269   :  { %1469 = vmatpush3.bf16.msra.mxu1 %v1468_v29 }
 0x26a   :  { %1470 = vmatprep.subr.bf16.mxu1 %v1648_v0 }
 0x26d   :  { %1472 = vmatpush3.bf16.msra.mxu1 %v1471_v32 }
 0x26e   :  { %1473 = vmatprep.subr.bf16.mxu1 %v1648_v0 }
 0x271   :  { %1475 = vmatpush3.bf16.msra.mxu1 %v1474_v35 }
 0x272   :  { %1476 = vmatprep.subr.bf16.mxu1 %v1648_v0 }
 0x275   :  { %1478 = vmatpush3.bf16.msra.mxu1 %v1477_v38 }
 0x276   :  { %1479 = vmatprep.subr.bf16.mxu1 %v1648_v0 }
 0x278   :  { %1310 = vmatmul.mubr.f32.vlgmr.msra.gmra.mrb[2].mxu1 %v687_v44 }
 0x279   :  { %1481 = vmatpush3.bf16.msra.mxu1 %v1480_v41  ;;  %1344 = vmatprep.mubr.msk.f32.mxu1 %vm1650_vm1, %v1649_v1  ;;  %v875_v1 = vld [vmem:[#allocation9 + $0x2d0] sm:$0xff] }
 0x27a   :  { %1482 = vmatprep.subr.bf16.mxu1 %v1648_v0  ;;  %v1495_v56 = vpack.c.bf16 %v876_v55, %v875_v1 }
 0x27d   :  { %1484 = vmatpush3.bf16.msra.mxu1 %v1483_v45 }
 0x27e   :  { %1485 = vmatprep.subr.bf16.mxu1 %v1648_v0 }
 0x281   :  { %1487 = vmatpush3.bf16.msra.mxu1 %v1486_v48 }
 0x282   :  { %1488 = vmatprep.subr.bf16.mxu1 %v1648_v0 }
 0x285   :  { %1490 = vmatpush3.bf16.msra.mxu1 %v1489_v51 }
 0x286   :  { %1491 = vmatprep.subr.bf16.mxu1 %v1648_v0 }
 0x289   :  { %1493 = vmatpush3.bf16.msra.mxu1 %v1492_v54 }
 0x28a   :  { %1494 = vmatprep.subr.bf16.mxu1 %v1648_v0 }
 0x28d   :  { %1496 = vmatpush3.bf16.msra.mxu1 %v1495_v56 }
 0x28e   :  { %1497 = vmatprep.subr.bf16.mxu1 %v1648_v0 }
 0x291   :  { %1499 = vmatpush3.bf16.msra.mxu1 %v1498_v59 }
 0x292   :  { %1500 = vmatprep.subr.bf16.mxu1 %v1648_v0 }
 0x295   :  { %1502 = vmatpush3.bf16.msra.mxu1 %v1501_v62 }
 0x298   :  { %1345 = vmatmul.mubr.f32.vlgmr.msra.gmra.mrb[2].mxu1 %v863_v63 }
 0x36b   :  { %v947_v3 = vpop.f32.mrb[2].mxu1 }
 0x36c   :  { %v957_v5 = vmul.f32 %v993_v2, %v947_v3  ;;  %v1346_v6 = vpop.f32.mrb[3].mxu1 }
 0x36e   :  { %v963_v7 = vadd.f32 %v994_v4, %v957_v5 }
 0x370   :  { %v964_v8 = vmax.f32 %v963_v7, 0.0 }
 0x372   :  { %v965_v0 = vadd.f32 %v964_v8, %v1821_v18 }
 0x374   :  { %966 = vst [vmem:[#allocation12 - $0x7] sm:$0x80] %v965_v0 }
 0x375   :  { %1623 = shalt.err (!%p1620_p8)
}
 0x376   :  { %s1624_s8 = scalar_lea.hbm %s1868_s5, 16 }
 0x377   :  { %p1625_p9 = scmp.ne.s32.totalorder %s1868_s5, %s1624_s8  ;;  %p1628_p10 = scmp.lt.u32.totalorder %s1624_s8, %s1868_s5 }
 0x379   :  { %p1630_p11 = pnand %p1628_p10, %p1625_p9 }
 0x37b   :  { %1633 = shalt.err (!%p1630_p11)
}
 0x37c   :  { %976 = dma.vmem_to_hbm [thread:$0]  %s974_s0, 16, %s1868_s5, [#allocation6]  }
 0x37d   :  { %1640 = dma.done.wait [#allocation6], 16  }
 0x37e   :  { %1641 = vsyncadd [#allocation6], 4294967280 }
 0x37f   :  { %980 = vsyncpa [#allocation5], 1 }
 0x380   :  { %981 = vsyncpa [#allocation8], 1 }
 0x381   :  { %982 = vsyncpa [#allocation11], 1 }
 0x382   :  { %983 = vsyncpa [#allocation6], 1 }

</bundles_post_ra>
